<compile_context>
chip_gen: v7x
topology: tpu7x:2x2x1
jax: 0.10.0
libtpu: 0.0.40
codegen_flags: <defaults>
</compile_context>

<pallas_src>
import math
import jax
import jax.numpy as jnp
from jax.experimental import pallas as pl
from jax.experimental.pallas import tpu as pltpu


def _round_up(n, m):
    return (n + m - 1) // m * m


def mlp_kernel(x_ref, w1_ref, b1_ref, w2_ref, b2_ref, o_ref):
    x = x_ref[...].astype(jnp.float32)
    # Hidden layer: Linear + Tanh (f32 MXU accumulation; tanh runs on the EUP).
    h = jnp.tanh(
        jnp.dot(x, w1_ref[...], preferred_element_type=jnp.float32) + b1_ref[...]
    )
    # Output layer: Linear.
    y = jnp.dot(h, w2_ref[...], preferred_element_type=jnp.float32) + b2_ref[...]
    o_ref[...] = y.astype(o_ref.dtype)


def init_linear_params(key, in_features, out_features, dtype=jnp.float32):
    """Mimics PyTorch nn.Linear default init: U(-1/sqrt(fan_in), 1/sqrt(fan_in)).
    Weight returned as (in_features, out_features) so the kernel does x @ W + b."""
    kw, kb = jax.random.split(key)
    bound = 1.0 / math.sqrt(in_features)
    w = jax.random.uniform(kw, (in_features, out_features), dtype, minval=-bound, maxval=bound)
    b = jax.random.uniform(kb, (1, out_features), dtype, minval=-bound, maxval=bound)
    return w, b


def pad_mlp_params(w1, b1, w2, b2):
    """ONE-TIME (setup-time) padding: only the hidden dim is padded to a multiple of 128.
    D_in and D_out stay unpadded. Zero hidden columns are numerically transparent:
    tanh(0*x + 0) = 0, and those zeros multiply zero rows of W2."""
    D_in, H = w1.shape
    D_out = w2.shape[1]
    H_p = _round_up(H, 128)
    f32 = jnp.float32
    w1_p = jnp.zeros((D_in, H_p), f32).at[:, :H].set(w1.astype(f32))
    b1_p = jnp.zeros((1, H_p), f32).at[:, :H].set(b1.astype(f32))
    w2_p = jnp.zeros((H_p, D_out), f32).at[:H, :].set(w2.astype(f32))
    b2_p = b2.astype(f32).reshape(1, D_out)
    return w1_p, b1_p, w2_p, b2_p


def one_hidden_layer_net(x, w1_p, b1_p, w2_p, b2_p, *, batch_tile=None):
    """Fused forward of Linear -> Tanh -> Linear.

    x:    (B, D_in)
    w1_p: (D_in, H_p),  b1_p: (1, H_p)      (hidden dim pre-padded to a multiple of 128)
    w2_p: (H_p, D_out), b2_p: (1, D_out)
    Returns (B, D_out) in x.dtype.
    """
    B, D_in = x.shape
    H_p = w1_p.shape[1]
    D_out = w2_p.shape[1]

    # Default: one grid step over the whole (8-aligned) batch — the grid is a serial loop and
    # per-step overhead dominates at these sizes. VMEM footprint is <1 MiB, so no tiling needed.
    if batch_tile is None:
        batch_tile_eff = _round_up(B, 8)
    else:
        batch_tile_eff = _round_up(min(batch_tile, _round_up(B, 8)), 8)
    B_p = _round_up(B, batch_tile_eff)

    # Pad the batch only if required for 8-row alignment / tiling (no copy in the common case).
    x_in = x if B_p == B else jnp.zeros((B_p, D_in), x.dtype).at[:B].set(x)

    grid = (B_p // batch_tile_eff,)
    # Plain "parallel" only matters when there is actually more than one step to shard.
    semantics = ("parallel",) if grid[0] > 1 else ("arbitrary",)

    cost = pl.CostEstimate(
        flops=2 * B_p * (D_in * H_p + H_p * D_out),
        transcendentals=B_p * H_p,
        bytes_accessed=4 * (
            B_p * D_in                 # x (unpadded feature dim)
            + D_in * H_p + H_p         # w1, b1
            + H_p * D_out + D_out      # w2, b2
            + B_p * D_out              # out (unpadded feature dim)
        ),
    )

    out = pl.pallas_call(
        mlp_kernel,
        out_shape=jax.ShapeDtypeStruct((B_p, D_out), x.dtype),
        grid_spec=pltpu.PrefetchScalarGridSpec(
            num_scalar_prefetch=0,
            grid=grid,
            in_specs=[
                pl.BlockSpec((batch_tile_eff, D_in), lambda i: (i, 0)),  # x tile (full D_in)
                pl.BlockSpec((D_in, H_p), lambda i: (0, 0)),             # W1 (resident)
                pl.BlockSpec((1, H_p), lambda i: (0, 0)),                # b1
                pl.BlockSpec((H_p, D_out), lambda i: (0, 0)),            # W2 (resident)
                pl.BlockSpec((1, D_out), lambda i: (0, 0)),              # b2
            ],
            out_specs=pl.BlockSpec((batch_tile_eff, D_out), lambda i: (i, 0)),
        ),
        compiler_params=pltpu.CompilerParams(dimension_semantics=semantics),
        cost_estimate=cost,
    )(x_in, w1_p, b1_p, w2_p, b2_p)

    # Drop batch padding rows only when they exist.
    return out if B_p == B else out[:B]


if __name__ == "__main__":
    # Small shapes consistent with the module's forward: x (batch, input_size).
    batch = 256
    input_size = 16
    hidden_size = 32
    output_size = 4

    key = jax.random.PRNGKey(0)
    kx, k1, k2 = jax.random.split(key, 3)

    x = jax.random.normal(kx, (batch, input_size), jnp.float32)
    w1, b1 = init_linear_params(k1, input_size, hidden_size)
    w2, b2 = init_linear_params(k2, hidden_size, output_size)

    # One-time, setup-time padding of parameters (not on the per-call path).
    w1_p, b1_p, w2_p, b2_p = pad_mlp_params(w1, b1, w2, b2)

    y = one_hidden_layer_net(x, w1_p, b1_p, w2_p, b2_p)
    y = jax.block_until_ready(y)

    # Pure-JAX reference check (same math, unpadded params).
    h_ref = jnp.tanh(x @ w1 + b1)
    y_ref = h_ref @ w2 + b2
    assert y.shape == (batch, output_size)
    assert jnp.allclose(y, y_ref, atol=1e-5, rtol=1e-5), "mismatch vs JAX reference"

    print("KERNEL_OK")
</pallas_src>

<mosaic_0001>
module attributes {stable_mosaic.version = 11 : i64} {
  func.func @mlp_kernel(%arg0: i32, %arg1: memref<256x16xf32, #tpu.memory_space<vmem>>, %arg2: memref<16x128xf32, #tpu.memory_space<vmem>>, %arg3: memref<1x128xf32, #tpu.memory_space<vmem>>, %arg4: memref<128x4xf32, #tpu.memory_space<vmem>>, %arg5: memref<1x4xf32, #tpu.memory_space<vmem>>, %arg6: memref<256x4xf32, #tpu.memory_space<vmem>>) attributes {dimension_semantics = [#tpu.dimension_semantics<arbitrary>], iteration_bounds = array<i64: 1>, scalar_prefetch = 0 : i64, scratch_operands = 0 : i64, tpu.core_type = #tpu.core_type<tc>, window_params = [{transform_indices = @transform_0, window_bounds = array<i64: 256, 16>}, {pipeline_mode = #tpu.pipeline_mode<synchronous>, transform_indices = @transform_1, window_bounds = array<i64: 16, 128>}, {pipeline_mode = #tpu.pipeline_mode<synchronous>, transform_indices = @transform_2, window_bounds = array<i64: 1, 128>}, {pipeline_mode = #tpu.pipeline_mode<synchronous>, transform_indices = @transform_3, window_bounds = array<i64: 128, 4>}, {pipeline_mode = #tpu.pipeline_mode<synchronous>, transform_indices = @transform_4, window_bounds = array<i64: 1, 4>}, {transform_indices = @transform_5, window_bounds = array<i64: 256, 4>}]} {
    %c0 = arith.constant 0 : index
    %c0_0 = arith.constant 0 : index
    %0 = vector.load %arg1[%c0, %c0_0] : memref<256x16xf32, #tpu.memory_space<vmem>>, vector<256x16xf32>
    %c0_1 = arith.constant 0 : index
    %c0_2 = arith.constant 0 : index
    %1 = vector.load %arg2[%c0_1, %c0_2] : memref<16x128xf32, #tpu.memory_space<vmem>>, vector<16x128xf32>
    %cst = arith.constant dense<0.000000e+00> : vector<256x128xf32>
    %2 = tpu.matmul %0, %1, %cst {dimension_numbers = #tpu.dot_dimension_numbers<[1], [0], [0], [1], [0, 0, 1, 1], [], []>} : vector<256x16xf32>, vector<16x128xf32>, vector<256x128xf32> -> vector<256x128xf32>
    %c0_3 = arith.constant 0 : index
    %c0_4 = arith.constant 0 : index
    %3 = vector.load %arg3[%c0_3, %c0_4] : memref<1x128xf32, #tpu.memory_space<vmem>>, vector<1x128xf32>
    %4 = vector.broadcast %3 : vector<1x128xf32> to vector<256x128xf32>
    %5 = arith.addf %2, %4 : vector<256x128xf32>
    %6 = math.tanh %5 : vector<256x128xf32>
    %c0_5 = arith.constant 0 : index
    %c0_6 = arith.constant 0 : index
    %7 = vector.load %arg4[%c0_5, %c0_6] : memref<128x4xf32, #tpu.memory_space<vmem>>, vector<128x4xf32>
    %cst_7 = arith.constant dense<0.000000e+00> : vector<256x4xf32>
    %8 = tpu.matmul %6, %7, %cst_7 {dimension_numbers = #tpu.dot_dimension_numbers<[1], [0], [0], [1], [0, 0, 1, 1], [], []>} : vector<256x128xf32>, vector<128x4xf32>, vector<256x4xf32> -> vector<256x4xf32>
    %c0_8 = arith.constant 0 : index
    %c0_9 = arith.constant 0 : index
    %9 = vector.load %arg5[%c0_8, %c0_9] : memref<1x4xf32, #tpu.memory_space<vmem>>, vector<1x4xf32>
    %10 = vector.broadcast %9 : vector<1x4xf32> to vector<256x4xf32>
    %11 = arith.addf %8, %10 : vector<256x4xf32>
    %c0_10 = arith.constant 0 : index
    %c0_11 = arith.constant 0 : index
    %12 = vector.load %arg6[%c0_10, %c0_11] : memref<256x4xf32, #tpu.memory_space<vmem>>, vector<256x4xf32>
    tpu.vector_store %arg6[%c0_10, %c0_11], %11 {strides = array<i32>} : memref<256x4xf32, #tpu.memory_space<vmem>>, vector<256x4xf32>,
    return
  }
  func.func @transform_0(%arg0: i32) -> (i32, i32) {
    %c0_i32 = arith.constant 0 : i32
    %c0_i32_0 = arith.constant 0 : i32
    return %arg0, %c0_i32 : i32, i32
  }
  func.func @transform_1(%arg0: i32) -> (i32, i32) {
    %c0_i32 = arith.constant 0 : i32
    %c0_i32_0 = arith.constant 0 : i32
    %c0_i32_1 = arith.constant 0 : i32
    return %c0_i32, %c0_i32_0 : i32, i32
  }
  func.func @transform_2(%arg0: i32) -> (i32, i32) {
    %c0_i32 = arith.constant 0 : i32
    %c0_i32_0 = arith.constant 0 : i32
    %c0_i32_1 = arith.constant 0 : i32
    return %c0_i32, %c0_i32_0 : i32, i32
  }
  func.func @transform_3(%arg0: i32) -> (i32, i32) {
    %c0_i32 = arith.constant 0 : i32
    %c0_i32_0 = arith.constant 0 : i32
    %c0_i32_1 = arith.constant 0 : i32
    return %c0_i32, %c0_i32_0 : i32, i32
  }
  func.func @transform_4(%arg0: i32) -> (i32, i32) {
    %c0_i32 = arith.constant 0 : i32
    %c0_i32_0 = arith.constant 0 : i32
    %c0_i32_1 = arith.constant 0 : i32
    return %c0_i32, %c0_i32_0 : i32, i32
  }
  func.func @transform_5(%arg0: i32) -> (i32, i32) {
    %c0_i32 = arith.constant 0 : i32
    %c0_i32_0 = arith.constant 0 : i32
    return %arg0, %c0_i32 : i32, i32
  }
}

</mosaic_0001>

<bundles_post_ra>
// kernel: tpu_custom_call.1
= control target key start
LH: loop header
LB: loop body
LE: loop exit
PB: predicated region body
PF: predicated region fallthrough
CT: control target
= control target key end

     0   :  { %vm61_vm0 = vcmask 130048   ;;  %vm663_vm1 = vcmask 31744   ;;  %s1478_s1 = inlined_call_operand.vmem [shape: f32[16,128], index: 1, kind: input, shape index: {}]   ;;  %s1479_s0 = inlined_call_operand.vmem [shape: f32[256,16], index: 0, kind: input, shape index: {}]   ;;  %s1480_s3 = inlined_call_operand.vmem [shape: f32[128,4], index: 3, kind: input, shape index: {}]   ;;  %s1481_s2 = inlined_call_operand.vmem [shape: f32[1,128], index: 2, kind: input, shape index: {}]   ;;  %s1482_s4 = inlined_call_operand.vmem [shape: f32[1,4], index: 4, kind: input, shape index: {}]   ;;  %s1483_s5 = inlined_call_operand.vmem [shape: f32[256,4], index: 5, kind: output, shape index: {}]  }
   0x1   :  { %v52_v0 = vld [vmem:[%s1478_s1] sm:$0xff]  ;;  %v53_v1 = vld [vmem:[%s1478_s1 + $0x8] sm:$0xff]  ;;  %v22_v5 = vld [vmem:[%s1479_s0 + $0x10] sm:$0xff] }
   0x2   :  { %v20_v2 = vld [vmem:[%s1479_s0] sm:$0xff]  ;;  %v948_v3 = vpack.c.bf16 %v53_v1, %v52_v0  ;;  %v21_v4 = vld [vmem:[%s1479_s0 + $0x8] sm:$0xff]  ;;  %v23_v6 = vld [vmem:[%s1479_s0 + $0x18] sm:$0xff] }
   0x3   :  { %820 = vmatprep.mubr.msk.f32.mxu0 %vm61_vm0, %v20_v2  ;;  %v24_v7 = vld [vmem:[%s1479_s0 + $0x20] sm:$0xff]  ;;  %v416_v9 = vld [vmem:[%s1480_s3 + $0x8] sm:$0xff]  ;;  %v417_v12 = vld [vmem:[%s1480_s3 + $0x10] sm:$0xff] }
   0x4   :  { %949 = vmatprep.subr.bf16.mxu0 %v948_v3  ;;  %v415_v8 = vld [vmem:[%s1480_s3] sm:$0xff]  ;;  %v25_v10 = vld [vmem:[%s1479_s0 + $0x28] sm:$0xff]  ;;  %v418_v13 = vld [vmem:[%s1480_s3 + $0x18] sm:$0xff] }
   0x5   :  { %951 = vmatpush3.bf16.msra.mxu0 %v948_v3  ;;  %v952_v11 = vpack.c.bf16 %v416_v9, %v415_v8  ;;  %v26_v14 = vld [vmem:[%s1479_s0 + $0x30] sm:$0xff]  ;;  %v956_v15 = vpack.c.bf16 %v418_v13, %v417_v12  ;;  %v419_v16 = vld [vmem:[%s1480_s3 + $0x20] sm:$0xff]  ;;  %v420_v17 = vld [vmem:[%s1480_s3 + $0x28] sm:$0xff] }
   0x6   :  { %v27_v18 = vld [vmem:[%s1479_s0 + $0x38] sm:$0xff]  ;;  %v28_v19 = vld [vmem:[%s1479_s0 + $0x40] sm:$0xff]  ;;  %v960_v20 = vpack.c.bf16 %v420_v17, %v419_v16  ;;  %v421_v21 = vld [vmem:[%s1480_s3 + $0x30] sm:$0xff] }
   0x7   :  { %953 = vmatprep.subr.bf16.mxu0 %v952_v11  ;;  %984 = vmatprep.subr.bf16.mxu1 %v952_v11  ;;  %v422_v22 = vld [vmem:[%s1480_s3 + $0x38] sm:$0xff]  ;;  %v29_v23 = vld [vmem:[%s1479_s0 + $0x48] sm:$0xff]  ;;  %v30_v24 = vld [vmem:[%s1479_s0 + $0x50] sm:$0xff] }
   0x8   :  { %821 = vmatmul.mubr.msk.f32.vlgmr.msra.gmra.mrb[0].mxu0 %vm61_vm0, %v21_v4  ;;  %992 = vmatpush3.bf16.msra.mxu1 %v952_v11  ;;  %v964_v25 = vpack.c.bf16 %v422_v22, %v421_v21  ;;  %v31_v26 = vld [vmem:[%s1479_s0 + $0x58] sm:$0xff]  ;;  %v32_v27 = vld [vmem:[%s1479_s0 + $0x60] sm:$0xff]  ;;  %v33_v28 = vld [vmem:[%s1479_s0 + $0x68] sm:$0xff] }
   0x9   :  { %823 = vmatprep.mubr.msk.f32.mxu0 %vm61_vm0, %v22_v5  ;;  %955 = vmatpush3.bf16.msra.mxu0 %v952_v11  ;;  %v34_v29 = vld [vmem:[%s1479_s0 + $0x70] sm:$0xff]  ;;  %v35_v30 = vld [vmem:[%s1479_s0 + $0x78] sm:$0xff]  ;;  %v36_v31 = vld [vmem:[%s1479_s0 + $0x80] sm:$0xff] }
   0xa   :  { %957 = vmatprep.subr.bf16.mxu0 %v956_v15  ;;  %985 = vmatprep.subr.bf16.mxu1 %v956_v15  ;;  %v37_v32 = vld [vmem:[%s1479_s0 + $0x88] sm:$0xff]  ;;  %v38_v33 = vld [vmem:[%s1479_s0 + $0x90] sm:$0xff]  ;;  %v39_v34 = vld [vmem:[%s1479_s0 + $0x98] sm:$0xff] }
   0xb   :  { %v40_v35 = vld [vmem:[%s1479_s0 + $0xa0] sm:$0xff]  ;;  %v41_v36 = vld [vmem:[%s1479_s0 + $0xa8] sm:$0xff]  ;;  %v42_v37 = vld [vmem:[%s1479_s0 + $0xb0] sm:$0xff] }
   0xc   :  { %824 = vmatmul.mubr.msk.f32.gmra.mrb[2].mxu0 %vm61_vm0, %v23_v6  ;;  %993 = vmatpush3.bf16.msra.mxu1 %v956_v15  ;;  %v43_v38 = vld [vmem:[%s1479_s0 + $0xb8] sm:$0xff]  ;;  %v44_v39 = vld [vmem:[%s1479_s0 + $0xc0] sm:$0xff]  ;;  %v45_v40 = vld [vmem:[%s1479_s0 + $0xc8] sm:$0xff] }
   0xd   :  { %826 = vmatprep.mubr.msk.f32.mxu0 %vm61_vm0, %v24_v7  ;;  %959 = vmatpush3.bf16.msra.mxu0 %v956_v15  ;;  %v46_v41 = vld [vmem:[%s1479_s0 + $0xd0] sm:$0xff]  ;;  %v47_v42 = vld [vmem:[%s1479_s0 + $0xd8] sm:$0xff]  ;;  %v48_v43 = vld [vmem:[%s1479_s0 + $0xe0] sm:$0xff] }
   0xe   :  { %961 = vmatprep.subr.bf16.mxu0 %v960_v20  ;;  %986 = vmatprep.subr.bf16.mxu1 %v960_v20  ;;  %v49_v44 = vld [vmem:[%s1479_s0 + $0xe8] sm:$0xff]  ;;  %v50_v45 = vld [vmem:[%s1479_s0 + $0xf0] sm:$0xff]  ;;  %v51_v46 = vld [vmem:[%s1479_s0 + $0xf8] sm:$0xff] }
   0xf   :  { %v423_v47 = vld [vmem:[%s1480_s3 + $0x40] sm:$0xff]  ;;  %v424_v48 = vld [vmem:[%s1480_s3 + $0x48] sm:$0xff]  ;;  %v425_v50 = vld [vmem:[%s1480_s3 + $0x50] sm:$0xff] }
  0x10   :  { %827 = vmatmul.mubr.msk.f32.gmra.mrb[4].mxu0 %vm61_vm0, %v25_v10  ;;  %994 = vmatpush3.bf16.msra.mxu1 %v960_v20  ;;  %v968_v49 = vpack.c.bf16 %v424_v48, %v423_v47  ;;  %v426_v51 = vld [vmem:[%s1480_s3 + $0x58] sm:$0xff]  ;;  %v427_v53 = vld [vmem:[%s1480_s3 + $0x60] sm:$0xff]  ;;  %v428_v54 = vld [vmem:[%s1480_s3 + $0x68] sm:$0xff] }
  0x11   :  { %829 = vmatprep.mubr.msk.f32.mxu0 %vm61_vm0, %v26_v14  ;;  %963 = vmatpush3.bf16.msra.mxu0 %v960_v20  ;;  %v972_v52 = vpack.c.bf16 %v426_v51, %v425_v50  ;;  %v976_v55 = vpack.c.bf16 %v428_v54, %v427_v53  ;;  %v429_v56 = vld [vmem:[%s1480_s3 + $0x70] sm:$0xff]  ;;  %v430_v57 = vld [vmem:[%s1480_s3 + $0x78] sm:$0xff]  ;;  %v1279_v59 = vld [vmem:[%s1481_s2] ss:$0 sm:$0xff] }
  0x12   :  { %965 = vmatprep.subr.bf16.mxu0 %v964_v25  ;;  %987 = vmatprep.subr.bf16.mxu1 %v964_v25  ;;  %v980_v58 = vpack.c.bf16 %v430_v57, %v429_v56 }
  0x14   :  { %830 = vmatmul.mubr.msk.f32.gmra.mrb[6].mxu0 %vm61_vm0, %v27_v18  ;;  %995 = vmatpush3.bf16.msra.mxu1 %v964_v25 }
  0x15   :  { %832 = vmatprep.mubr.msk.f32.mxu0 %vm61_vm0, %v28_v19  ;;  %967 = vmatpush3.bf16.msra.mxu0 %v964_v25 }
  0x16   :  { %969 = vmatprep.subr.bf16.mxu0 %v968_v49  ;;  %988 = vmatprep.subr.bf16.mxu1 %v968_v49 }
  0x18   :  { %833 = vmatmul.mubr.msk.f32.gmra.mrb[8].mxu0 %vm61_vm0, %v29_v23  ;;  %996 = vmatpush3.bf16.msra.mxu1 %v968_v49 }
  0x19   :  { %835 = vmatprep.mubr.msk.f32.mxu0 %vm61_vm0, %v30_v24  ;;  %971 = vmatpush3.bf16.msra.mxu0 %v968_v49 }
  0x1a   :  { %973 = vmatprep.subr.bf16.mxu0 %v972_v52  ;;  %989 = vmatprep.subr.bf16.mxu1 %v972_v52 }
  0x1c   :  { %836 = vmatmul.mubr.msk.f32.gmra.mrb[10].mxu0 %vm61_vm0, %v31_v26  ;;  %997 = vmatpush3.bf16.msra.mxu1 %v972_v52 }
  0x1d   :  { %838 = vmatprep.mubr.msk.f32.mxu0 %vm61_vm0, %v32_v27  ;;  %975 = vmatpush3.bf16.msra.mxu0 %v972_v52 }
  0x1e   :  { %977 = vmatprep.subr.bf16.mxu0 %v976_v55  ;;  %990 = vmatprep.subr.bf16.mxu1 %v976_v55 }
  0x20   :  { %839 = vmatmul.mubr.msk.f32.gmra.mrb[12].mxu0 %vm61_vm0, %v33_v28  ;;  %998 = vmatpush3.bf16.msra.mxu1 %v976_v55 }
  0x21   :  { %841 = vmatprep.mubr.msk.f32.mxu0 %vm61_vm0, %v34_v29  ;;  %979 = vmatpush3.bf16.msra.mxu0 %v976_v55 }
  0x22   :  { %981 = vmatprep.subr.bf16.mxu0 %v980_v58  ;;  %991 = vmatprep.subr.bf16.mxu1 %v980_v58 }
  0x24   :  { %842 = vmatmul.mubr.msk.f32.gmra.mrb[14].mxu0 %vm61_vm0, %v35_v30  ;;  %999 = vmatpush3.bf16.msra.mxu1 %v980_v58 }
  0x25   :  { %844 = vmatprep.mubr.msk.f32.mxu0 %vm61_vm0, %v36_v31  ;;  %983 = vmatpush3.bf16.msra.mxu0 %v980_v58 }
  0x28   :  { %845 = vmatmul.mubr.msk.f32.gmra.mrb[16].mxu0 %vm61_vm0, %v37_v32 }
  0x29   :  { %847 = vmatprep.mubr.msk.f32.mxu0 %vm61_vm0, %v38_v33 }
  0x2c   :  { %848 = vmatmul.mubr.msk.f32.gmra.mrb[18].mxu0 %vm61_vm0, %v39_v34 }
  0x2d   :  { %850 = vmatprep.mubr.msk.f32.mxu0 %vm61_vm0, %v40_v35 }
  0x30   :  { %851 = vmatmul.mubr.msk.f32.gmra.mrb[20].mxu0 %vm61_vm0, %v41_v36 }
  0x31   :  { %853 = vmatprep.mubr.msk.f32.mxu0 %vm61_vm0, %v42_v37 }
  0x34   :  { %854 = vmatmul.mubr.msk.f32.gmra.mrb[22].mxu0 %vm61_vm0, %v43_v38 }
  0x35   :  { %856 = vmatprep.mubr.msk.f32.mxu0 %vm61_vm0, %v44_v39 }
  0x38   :  { %857 = vmatmul.mubr.msk.f32.gmra.mrb[24].mxu0 %vm61_vm0, %v45_v40 }
  0x39   :  { %859 = vmatprep.mubr.msk.f32.mxu0 %vm61_vm0, %v46_v41 }
  0x3c   :  { %860 = vmatmul.mubr.msk.f32.gmra.mrb[26].mxu0 %vm61_vm0, %v47_v42 }
  0x3d   :  { %862 = vmatprep.mubr.msk.f32.mxu0 %vm61_vm0, %v48_v43 }
  0x40   :  { %863 = vmatmul.mubr.msk.f32.gmra.mrb[28].mxu0 %vm61_vm0, %v49_v44 }
  0x41   :  { %865 = vmatprep.mubr.msk.f32.mxu0 %vm61_vm0, %v50_v45 }
  0x44   :  { %866 = vmatmul.mubr.msk.f32.gmra.mrb[30].mxu0 %vm61_vm0, %v51_v46 }
  0xdb   :  { %v822_v60 = vpop.f32.mrb[0].mxu0 }
  0xdc   :  { %v230_v61 = vadd.f32 %v822_v60, %v1279_v59  ;;  %v224_v62 = vpop.f32.mrb[1].mxu0 }
  0xdd   :  { %v225_v63 = vadd.f32 %v1279_v59, %v224_v62 }
  0xdf   :  { %1000 = vtanh.f32 %v225_v63  ;;  %v825_v0 = vpop.f32.mrb[2].mxu0 }
  0xe0   :  { %1002 = vtanh.f32 %v230_v61  ;;  %v240_v1 = vadd.f32 %v825_v0, %v1279_v59  ;;  %v234_v2 = vpop.f32.mrb[3].mxu0 }
  0xe1   :  { %v235_v3 = vadd.f32 %v1279_v59, %v234_v2 }
  0xe3   :  { %1004 = vtanh.f32 %v235_v3  ;;  %v828_v4 = vpop.f32.mrb[4].mxu0 }
  0xe4   :  { %1006 = vtanh.f32 %v240_v1  ;;  %v250_v5 = vadd.f32 %v828_v4, %v1279_v59  ;;  %v244_v6 = vpop.f32.mrb[5].mxu0 }
  0xe5   :  { %v245_v7 = vadd.f32 %v1279_v59, %v244_v6 }
  0xe7   :  { %1008 = vtanh.f32 %v245_v7  ;;  %v831_v8 = vpop.f32.mrb[6].mxu0 }
  0xe8   :  { %1010 = vtanh.f32 %v250_v5  ;;  %v260_v9 = vadd.f32 %v831_v8, %v1279_v59  ;;  %v254_v10 = vpop.f32.mrb[7].mxu0 }
  0xe9   :  { %v1001_v11 = vpop.eup %1000  ;;  %v255_v12 = vadd.f32 %v1279_v59, %v254_v10 }
  0xea   :  { %v1003_v13 = vpop.eup %1002  ;;  %900 = vmatprep.mubr.f32.mxu0 %v1001_v11 }
  0xeb   :  { %1012 = vtanh.f32 %v255_v12  ;;  %v834_v14 = vpop.f32.mrb[8].mxu0  ;;  %901 = vmatmul.mubr.f32.vlgmr.msra.gmra.mrb[32].mxu0 %v1003_v13 }
  0xec   :  { %1014 = vtanh.f32 %v260_v9  ;;  %v270_v15 = vadd.f32 %v834_v14, %v1279_v59  ;;  %v264_v16 = vpop.f32.mrb[9].mxu0 }
  0xed   :  { %v1005_v17 = vpop.eup %1004  ;;  %v265_v18 = vadd.f32 %v1279_v59, %v264_v16 }
  0xee   :  { %v1007_v19 = vpop.eup %1006  ;;  %903 = vmatprep.mubr.f32.mxu0 %v1005_v17 }
  0xef   :  { %1016 = vtanh.f32 %v265_v18  ;;  %v837_v20 = vpop.f32.mrb[10].mxu0  ;;  %904 = vmatmul.mubr.f32.gmra.mrb[34].mxu0 %v1007_v19 }
  0xf0   :  { %1018 = vtanh.f32 %v270_v15  ;;  %v280_v21 = vadd.f32 %v837_v20, %v1279_v59  ;;  %v274_v22 = vpop.f32.mrb[11].mxu0 }
  0xf1   :  { %v1009_v23 = vpop.eup %1008  ;;  %v275_v24 = vadd.f32 %v1279_v59, %v274_v22 }
  0xf2   :  { %v1011_v25 = vpop.eup %1010  ;;  %906 = vmatprep.mubr.f32.mxu0 %v1009_v23 }
  0xf3   :  { %1020 = vtanh.f32 %v275_v24  ;;  %v840_v26 = vpop.f32.mrb[12].mxu0  ;;  %907 = vmatmul.mubr.f32.gmra.mrb[36].mxu0 %v1011_v25 }
  0xf4   :  { %1022 = vtanh.f32 %v280_v21  ;;  %v290_v27 = vadd.f32 %v840_v26, %v1279_v59  ;;  %v284_v28 = vpop.f32.mrb[13].mxu0 }
  0xf5   :  { %v1013_v29 = vpop.eup %1012  ;;  %v285_v30 = vadd.f32 %v1279_v59, %v284_v28 }
  0xf6   :  { %v1015_v31 = vpop.eup %1014  ;;  %909 = vmatprep.mubr.f32.mxu1 %v1013_v29 }
  0xf7   :  { %1024 = vtanh.f32 %v285_v30  ;;  %v843_v32 = vpop.f32.mrb[14].mxu0  ;;  %910 = vmatmul.mubr.f32.vlgmr.msra.gmra.mrb[0].mxu1 %v1015_v31 }
  0xf8   :  { %1026 = vtanh.f32 %v290_v27  ;;  %v300_v33 = vadd.f32 %v843_v32, %v1279_v59  ;;  %v294_v34 = vpop.f32.mrb[15].mxu0 }
  0xf9   :  { %v1017_v35 = vpop.eup %1016  ;;  %v295_v36 = vadd.f32 %v1279_v59, %v294_v34 }
  0xfa   :  { %v1019_v37 = vpop.eup %1018  ;;  %912 = vmatprep.mubr.f32.mxu1 %v1017_v35 }
  0xfb   :  { %1028 = vtanh.f32 %v295_v36  ;;  %v846_v38 = vpop.f32.mrb[16].mxu0  ;;  %913 = vmatmul.mubr.f32.gmra.mrb[2].mxu1 %v1019_v37 }
  0xfc   :  { %1030 = vtanh.f32 %v300_v33  ;;  %v310_v39 = vadd.f32 %v846_v38, %v1279_v59  ;;  %v304_v40 = vpop.f32.mrb[17].mxu0 }
  0xfd   :  { %v1021_v41 = vpop.eup %1020  ;;  %v305_v42 = vadd.f32 %v1279_v59, %v304_v40 }
  0xfe   :  { %v1023_v43 = vpop.eup %1022  ;;  %915 = vmatprep.mubr.f32.mxu1 %v1021_v41 }
  0xff   :  { %1032 = vtanh.f32 %v305_v42  ;;  %v849_v44 = vpop.f32.mrb[18].mxu0  ;;  %916 = vmatmul.mubr.f32.gmra.mrb[4].mxu1 %v1023_v43 }
 0x100   :  { %1034 = vtanh.f32 %v310_v39  ;;  %v320_v45 = vadd.f32 %v849_v44, %v1279_v59  ;;  %v314_v46 = vpop.f32.mrb[19].mxu0 }
 0x101   :  { %v1025_v47 = vpop.eup %1024  ;;  %v315_v48 = vadd.f32 %v1279_v59, %v314_v46 }
 0x102   :  { %v1027_v49 = vpop.eup %1026  ;;  %918 = vmatprep.mubr.f32.mxu1 %v1025_v47 }
 0x103   :  { %1036 = vtanh.f32 %v315_v48  ;;  %v852_v50 = vpop.f32.mrb[20].mxu0  ;;  %919 = vmatmul.mubr.f32.gmra.mrb[6].mxu1 %v1027_v49 }
 0x104   :  { %1038 = vtanh.f32 %v320_v45  ;;  %v330_v51 = vadd.f32 %v852_v50, %v1279_v59  ;;  %v324_v52 = vpop.f32.mrb[21].mxu0 }
 0x105   :  { %v1029_v53 = vpop.eup %1028  ;;  %v325_v54 = vadd.f32 %v1279_v59, %v324_v52 }
 0x106   :  { %v1031_v55 = vpop.eup %1030  ;;  %921 = vmatprep.mubr.f32.mxu1 %v1029_v53 }
 0x107   :  { %1040 = vtanh.f32 %v325_v54  ;;  %v855_v56 = vpop.f32.mrb[22].mxu0  ;;  %922 = vmatmul.mubr.f32.gmra.mrb[8].mxu1 %v1031_v55 }
 0x108   :  { %1042 = vtanh.f32 %v330_v51  ;;  %v340_v57 = vadd.f32 %v855_v56, %v1279_v59  ;;  %v334_v58 = vpop.f32.mrb[23].mxu0 }
 0x109   :  { %v1033_v60 = vpop.eup %1032  ;;  %v335_v61 = vadd.f32 %v1279_v59, %v334_v58 }
 0x10a   :  { %v1035_v62 = vpop.eup %1034  ;;  %924 = vmatprep.mubr.f32.mxu1 %v1033_v60 }
 0x10b   :  { %1044 = vtanh.f32 %v335_v61  ;;  %v858_v63 = vpop.f32.mrb[24].mxu0  ;;  %925 = vmatmul.mubr.f32.gmra.mrb[10].mxu1 %v1035_v62 }
 0x10c   :  { %1046 = vtanh.f32 %v340_v57  ;;  %v350_v0 = vadd.f32 %v858_v63, %v1279_v59  ;;  %v344_v1 = vpop.f32.mrb[25].mxu0 }
 0x10d   :  { %v1037_v2 = vpop.eup %1036  ;;  %v345_v3 = vadd.f32 %v1279_v59, %v344_v1 }
 0x10e   :  { %v1039_v4 = vpop.eup %1038  ;;  %927 = vmatprep.mubr.f32.mxu1 %v1037_v2 }
 0x10f   :  { %1048 = vtanh.f32 %v345_v3  ;;  %v861_v5 = vpop.f32.mrb[26].mxu0  ;;  %928 = vmatmul.mubr.f32.gmra.mrb[12].mxu1 %v1039_v4 }
 0x110   :  { %1050 = vtanh.f32 %v350_v0  ;;  %v360_v6 = vadd.f32 %v861_v5, %v1279_v59  ;;  %v354_v7 = vpop.f32.mrb[27].mxu0 }
 0x111   :  { %v1041_v8 = vpop.eup %1040  ;;  %v355_v9 = vadd.f32 %v1279_v59, %v354_v7 }
 0x112   :  { %v1043_v10 = vpop.eup %1042  ;;  %930 = vmatprep.mubr.f32.mxu1 %v1041_v8 }
 0x113   :  { %1052 = vtanh.f32 %v355_v9  ;;  %v864_v11 = vpop.f32.mrb[28].mxu0  ;;  %931 = vmatmul.mubr.f32.gmra.mrb[14].mxu1 %v1043_v10 }
 0x114   :  { %1054 = vtanh.f32 %v360_v6  ;;  %v370_v12 = vadd.f32 %v864_v11, %v1279_v59  ;;  %v364_v13 = vpop.f32.mrb[29].mxu0 }
 0x115   :  { %v1045_v14 = vpop.eup %1044  ;;  %v365_v15 = vadd.f32 %v1279_v59, %v364_v13 }
 0x116   :  { %v1047_v16 = vpop.eup %1046  ;;  %933 = vmatprep.mubr.f32.mxu1 %v1045_v14 }
 0x117   :  { %1056 = vtanh.f32 %v365_v15  ;;  %v867_v17 = vpop.f32.mrb[30].mxu0  ;;  %934 = vmatmul.mubr.f32.gmra.mrb[16].mxu1 %v1047_v16 }
 0x118   :  { %1058 = vtanh.f32 %v370_v12  ;;  %v380_v18 = vadd.f32 %v867_v17, %v1279_v59  ;;  %v374_v19 = vpop.f32.mrb[31].mxu0 }
 0x119   :  { %v1049_v20 = vpop.eup %1048  ;;  %v375_v21 = vadd.f32 %v1279_v59, %v374_v19  ;;  %v1316_v59 = vld [vmem:[%s1482_s4] ss:$0 sm:$0xff] }
 0x11a   :  { %v1051_v22 = vpop.eup %1050  ;;  %936 = vmatprep.mubr.f32.mxu1 %v1049_v20 }
 0x11b   :  { %1060 = vtanh.f32 %v375_v21  ;;  %937 = vmatmul.mubr.f32.gmra.mrb[18].mxu1 %v1051_v22 }
 0x11c   :  { %1062 = vtanh.f32 %v380_v18 }
 0x11d   :  { %v1053_v23 = vpop.eup %1052 }
 0x11e   :  { %v1055_v24 = vpop.eup %1054  ;;  %939 = vmatprep.mubr.f32.mxu1 %v1053_v23 }
 0x11f   :  { %940 = vmatmul.mubr.f32.gmra.mrb[20].mxu1 %v1055_v24 }
 0x121   :  { %v1057_v25 = vpop.eup %1056 }
 0x122   :  { %v1059_v26 = vpop.eup %1058  ;;  %942 = vmatprep.mubr.f32.mxu1 %v1057_v25 }
 0x123   :  { %943 = vmatmul.mubr.f32.gmra.mrb[22].mxu1 %v1059_v26 }
 0x125   :  { %v1061_v27 = vpop.eup %1060 }
 0x126   :  { %v1063_v28 = vpop.eup %1062  ;;  %945 = vmatprep.mubr.f32.mxu1 %v1061_v27 }
 0x127   :  { %946 = vmatmul.mubr.f32.gmra.mrb[24].mxu1 %v1063_v28 }
 0x1be   :  { %v902_v29 = vpop.f32.mrb[32].mxu0 }
 0x1bf   :  { %v510_v30 = vadd.f32 %v902_v29, %v1316_v59  ;;  %v504_v31 = vpop.f32.mrb[33].mxu0 }
 0x1c0   :  { %v505_v32 = vadd.f32 %v1316_v59, %v504_v31 }
 0x1c1   :  { %665 = vst.msk [vmem:[%s1483_s5 + $0x8] sm:$0xff] %vm663_vm1, %v510_v30 }
 0x1c2   :  { %664 = vst.msk [vmem:[%s1483_s5] sm:$0xff] %vm663_vm1, %v505_v32  ;;  %v905_v33 = vpop.f32.mrb[34].mxu0 }
 0x1c3   :  { %v520_v34 = vadd.f32 %v905_v33, %v1316_v59  ;;  %v514_v35 = vpop.f32.mrb[35].mxu0 }
 0x1c4   :  { %v515_v36 = vadd.f32 %v1316_v59, %v514_v35 }
 0x1c5   :  { %667 = vst.msk [vmem:[%s1483_s5 + $0x18] sm:$0xff] %vm663_vm1, %v520_v34 }
 0x1c6   :  { %666 = vst.msk [vmem:[%s1483_s5 + $0x10] sm:$0xff] %vm663_vm1, %v515_v36  ;;  %v908_v37 = vpop.f32.mrb[36].mxu0 }
 0x1c7   :  { %v530_v38 = vadd.f32 %v908_v37, %v1316_v59  ;;  %v524_v39 = vpop.f32.mrb[37].mxu0 }
 0x1c8   :  { %v525_v40 = vadd.f32 %v1316_v59, %v524_v39 }
 0x1c9   :  { %669 = vst.msk [vmem:[%s1483_s5 + $0x28] sm:$0xff] %vm663_vm1, %v530_v38 }
 0x1ca   :  { %668 = vst.msk [vmem:[%s1483_s5 + $0x20] sm:$0xff] %vm663_vm1, %v525_v40  ;;  %v911_v41 = vpop.f32.mrb[0].mxu1 }
 0x1cb   :  { %v540_v42 = vadd.f32 %v911_v41, %v1316_v59  ;;  %v534_v43 = vpop.f32.mrb[1].mxu1 }
 0x1cc   :  { %v535_v44 = vadd.f32 %v1316_v59, %v534_v43 }
 0x1cd   :  { %671 = vst.msk [vmem:[%s1483_s5 + $0x38] sm:$0xff] %vm663_vm1, %v540_v42 }
 0x1ce   :  { %670 = vst.msk [vmem:[%s1483_s5 + $0x30] sm:$0xff] %vm663_vm1, %v535_v44  ;;  %v914_v45 = vpop.f32.mrb[2].mxu1 }
 0x1cf   :  { %v550_v46 = vadd.f32 %v914_v45, %v1316_v59  ;;  %v544_v47 = vpop.f32.mrb[3].mxu1 }
 0x1d0   :  { %v545_v48 = vadd.f32 %v1316_v59, %v544_v47 }
 0x1d1   :  { %673 = vst.msk [vmem:[%s1483_s5 + $0x48] sm:$0xff] %vm663_vm1, %v550_v46 }
 0x1d2   :  { %672 = vst.msk [vmem:[%s1483_s5 + $0x40] sm:$0xff] %vm663_vm1, %v545_v48  ;;  %v917_v49 = vpop.f32.mrb[4].mxu1 }
 0x1d3   :  { %v560_v50 = vadd.f32 %v917_v49, %v1316_v59  ;;  %v554_v51 = vpop.f32.mrb[5].mxu1 }
 0x1d4   :  { %v555_v52 = vadd.f32 %v1316_v59, %v554_v51 }
 0x1d5   :  { %675 = vst.msk [vmem:[%s1483_s5 + $0x58] sm:$0xff] %vm663_vm1, %v560_v50 }
 0x1d6   :  { %674 = vst.msk [vmem:[%s1483_s5 + $0x50] sm:$0xff] %vm663_vm1, %v555_v52  ;;  %v920_v53 = vpop.f32.mrb[6].mxu1 }
 0x1d7   :  { %v570_v54 = vadd.f32 %v920_v53, %v1316_v59  ;;  %v564_v55 = vpop.f32.mrb[7].mxu1 }
 0x1d8   :  { %v565_v56 = vadd.f32 %v1316_v59, %v564_v55 }
 0x1d9   :  { %677 = vst.msk [vmem:[%s1483_s5 + $0x68] sm:$0xff] %vm663_vm1, %v570_v54 }
 0x1da   :  { %676 = vst.msk [vmem:[%s1483_s5 + $0x60] sm:$0xff] %vm663_vm1, %v565_v56  ;;  %v923_v57 = vpop.f32.mrb[8].mxu1 }
 0x1db   :  { %v580_v58 = vadd.f32 %v923_v57, %v1316_v59  ;;  %v574_v60 = vpop.f32.mrb[9].mxu1 }
 0x1dc   :  { %v575_v61 = vadd.f32 %v1316_v59, %v574_v60 }
 0x1dd   :  { %679 = vst.msk [vmem:[%s1483_s5 + $0x78] sm:$0xff] %vm663_vm1, %v580_v58 }
 0x1de   :  { %678 = vst.msk [vmem:[%s1483_s5 + $0x70] sm:$0xff] %vm663_vm1, %v575_v61  ;;  %v926_v62 = vpop.f32.mrb[10].mxu1 }
 0x1df   :  { %v590_v63 = vadd.f32 %v926_v62, %v1316_v59  ;;  %v584_v0 = vpop.f32.mrb[11].mxu1 }
 0x1e0   :  { %v585_v1 = vadd.f32 %v1316_v59, %v584_v0 }
 0x1e1   :  { %681 = vst.msk [vmem:[%s1483_s5 + $0x88] sm:$0xff] %vm663_vm1, %v590_v63 }
 0x1e2   :  { %680 = vst.msk [vmem:[%s1483_s5 + $0x80] sm:$0xff] %vm663_vm1, %v585_v1  ;;  %v929_v2 = vpop.f32.mrb[12].mxu1 }
 0x1e3   :  { %v600_v3 = vadd.f32 %v929_v2, %v1316_v59  ;;  %v594_v4 = vpop.f32.mrb[13].mxu1 }
 0x1e4   :  { %v595_v5 = vadd.f32 %v1316_v59, %v594_v4 }
 0x1e5   :  { %683 = vst.msk [vmem:[%s1483_s5 + $0x98] sm:$0xff] %vm663_vm1, %v600_v3 }
 0x1e6   :  { %682 = vst.msk [vmem:[%s1483_s5 + $0x90] sm:$0xff] %vm663_vm1, %v595_v5  ;;  %v932_v6 = vpop.f32.mrb[14].mxu1 }
 0x1e7   :  { %v610_v7 = vadd.f32 %v932_v6, %v1316_v59  ;;  %v604_v8 = vpop.f32.mrb[15].mxu1 }
 0x1e8   :  { %v605_v9 = vadd.f32 %v1316_v59, %v604_v8 }
 0x1e9   :  { %685 = vst.msk [vmem:[%s1483_s5 + $0xa8] sm:$0xff] %vm663_vm1, %v610_v7 }
 0x1ea   :  { %684 = vst.msk [vmem:[%s1483_s5 + $0xa0] sm:$0xff] %vm663_vm1, %v605_v9  ;;  %v935_v10 = vpop.f32.mrb[16].mxu1 }
 0x1eb   :  { %v620_v11 = vadd.f32 %v935_v10, %v1316_v59  ;;  %v614_v12 = vpop.f32.mrb[17].mxu1 }
 0x1ec   :  { %v615_v13 = vadd.f32 %v1316_v59, %v614_v12 }
 0x1ed   :  { %687 = vst.msk [vmem:[%s1483_s5 + $0xb8] sm:$0xff] %vm663_vm1, %v620_v11 }
 0x1ee   :  { %686 = vst.msk [vmem:[%s1483_s5 + $0xb0] sm:$0xff] %vm663_vm1, %v615_v13  ;;  %v938_v14 = vpop.f32.mrb[18].mxu1 }
 0x1ef   :  { %v630_v15 = vadd.f32 %v938_v14, %v1316_v59  ;;  %v624_v16 = vpop.f32.mrb[19].mxu1 }
 0x1f0   :  { %v625_v17 = vadd.f32 %v1316_v59, %v624_v16 }
 0x1f1   :  { %689 = vst.msk [vmem:[%s1483_s5 + $0xc8] sm:$0xff] %vm663_vm1, %v630_v15 }
 0x1f2   :  { %688 = vst.msk [vmem:[%s1483_s5 + $0xc0] sm:$0xff] %vm663_vm1, %v625_v17  ;;  %v941_v18 = vpop.f32.mrb[20].mxu1 }
 0x1f3   :  { %v640_v19 = vadd.f32 %v941_v18, %v1316_v59  ;;  %v634_v20 = vpop.f32.mrb[21].mxu1 }
 0x1f4   :  { %v635_v21 = vadd.f32 %v1316_v59, %v634_v20 }
 0x1f5   :  { %691 = vst.msk [vmem:[%s1483_s5 + $0xd8] sm:$0xff] %vm663_vm1, %v640_v19 }
 0x1f6   :  { %690 = vst.msk [vmem:[%s1483_s5 + $0xd0] sm:$0xff] %vm663_vm1, %v635_v21  ;;  %v944_v22 = vpop.f32.mrb[22].mxu1 }
 0x1f7   :  { %v650_v23 = vadd.f32 %v944_v22, %v1316_v59  ;;  %v644_v24 = vpop.f32.mrb[23].mxu1 }
 0x1f8   :  { %v645_v25 = vadd.f32 %v1316_v59, %v644_v24 }
 0x1f9   :  { %693 = vst.msk [vmem:[%s1483_s5 + $0xe8] sm:$0xff] %vm663_vm1, %v650_v23 }
 0x1fa   :  { %692 = vst.msk [vmem:[%s1483_s5 + $0xe0] sm:$0xff] %vm663_vm1, %v645_v25  ;;  %v947_v26 = vpop.f32.mrb[24].mxu1 }
 0x1fb   :  { %v660_v27 = vadd.f32 %v947_v26, %v1316_v59  ;;  %v654_v28 = vpop.f32.mrb[25].mxu1 }
 0x1fc   :  { %v655_v29 = vadd.f32 %v1316_v59, %v654_v28 }
 0x1fd   :  { %695 = vst.msk [vmem:[%s1483_s5 + $0xf8] sm:$0xff] %vm663_vm1, %v660_v27 }
 0x1fe   :  { %694 = vst.msk [vmem:[%s1483_s5 + $0xf0] sm:$0xff] %vm663_vm1, %v655_v29 }

</bundles_post_ra>
